<compile_context>
chip_gen: v6e
topology: v6e:2x2x1
jax: 0.10.0
libtpu: 0.0.40
codegen_flags: <defaults>
</compile_context>

<pallas_src>
import math

import jax
import jax.numpy as jnp
from jax.experimental import pallas as pl
from jax.experimental.pallas import tpu as pltpu

_LANE = 128
# ~2 MiB per tile => 2 in + 2 out double-buffers ≈ 8 MiB VMEM: safe on
# v5e (16 MiB scoped default), v6e (32 MiB) and v7x (64 MiB physical).
_TILE_BYTES = 2 * 1024 * 1024


def _copy_kernel(x_ref, o_ref):
    # Identity copy of the current tile (a view has no other compute).
    o_ref[...] = x_ref[...]


def _sublane(dtype) -> int:
    # Sublane tiling multiple: 8 for 32-bit, 16 for 16-bit, 32 for 8-bit.
    return {4: 8, 2: 16, 1: 32}.get(jnp.dtype(dtype).itemsize, 8)


def _pick_layout(total: int, dtype) -> tuple[int, int, int]:
    """Pick (rows, lanes, pad_elems): a lane-dense [rows, lanes] slab with
    lanes a multiple of 128 and rows a multiple of the sublane tile."""
    sub = _sublane(dtype)
    # Prefer the widest lane dim that needs no padding.
    for lanes in (2048, 1024, 512, 256, 128):
        if total % lanes == 0 and (total // lanes) % sub == 0:
            return total // lanes, lanes, 0
    # Fallback for awkward totals: pad up to a multiple of (sub * 512) so the
    # copy stays on the fast unmasked, tiled path at any size.
    lanes = 512
    chunk = sub * lanes
    padded = ((total + chunk - 1) // chunk) * chunk
    return padded // lanes, lanes, padded - total


def _tiled_copy(flat: jax.Array) -> jax.Array:
    rows, lanes = flat.shape
    itemsize = jnp.dtype(flat.dtype).itemsize
    sub = _sublane(flat.dtype)
    # Row-tile size targeting ~_TILE_BYTES, rounded down to the sublane multiple.
    tr = max(sub, (_TILE_BYTES // (lanes * itemsize)) // sub * sub)
    tr = min(tr, rows)
    grid = (pl.cdiv(rows, tr),)
    return pl.pallas_call(
        _copy_kernel,
        out_shape=jax.ShapeDtypeStruct(flat.shape, flat.dtype),
        grid_spec=pltpu.PrefetchScalarGridSpec(
            num_scalar_prefetch=0,
            grid=grid,
            in_specs=[pl.BlockSpec((tr, lanes), lambda i: (i, 0))],
            out_specs=pl.BlockSpec((tr, lanes), lambda i: (i, 0)),
        ),
        compiler_params=pltpu.CompilerParams(
            # Pure copy is trivially data-parallel; lets v7x shard the grid
            # across its 2 TensorCores (neutral but harmless on v5e/v6e).
            dimension_semantics=("parallel",),
        ),
        cost_estimate=pl.CostEstimate(
            flops=0,
            transcendentals=0,
            bytes_accessed=2 * rows * lanes * itemsize,
        ),
    )(flat)


def unflatten(x: jax.Array, size) -> jax.Array:
    """Equivalent of torch `input.view(size)` (one -1 allowed)."""
    size = tuple(int(s) for s in size)
    total = x.size

    if size.count(-1) > 1:
        raise ValueError("only one dimension can be inferred (-1)")
    if -1 in size:
        known = math.prod(s for s in size if s != -1)
        if known == 0 or total % known != 0:
            raise ValueError(f"cannot view shape {x.shape} as {size}")
        size = tuple(total // known if s == -1 else s for s in size)
    if math.prod(size) != total:
        raise ValueError(f"view size mismatch: {x.shape} -> {size}")

    rows, lanes, pad = _pick_layout(total, x.dtype)
    flat = x.reshape(-1)
    if pad:
        # TODO(synk): pad adds extra traffic; only hit when total has no
        # 128-friendly factorization.
        flat = jnp.pad(flat, (0, pad))
    out_flat = _tiled_copy(flat.reshape(rows, lanes)).reshape(-1)
    if pad:
        out_flat = out_flat[:total]

    # NOTE: a true view needs zero data movement; we deliberately do NOT pass
    # input_output_aliases={0: 0} so the caller's input stays valid (view
    # semantics keep the source alive).  The actual "UnFlatten" is metadata:
    return out_flat.reshape(size)


if __name__ == "__main__":
    key = jax.random.PRNGKey(0)
    # Typical autoencoder usage: flat latent (batch, C*H*W) -> NCHW.
    batch, C, H, W = 2, 4, 16, 16
    x = jax.random.normal(key, (batch, C * H * W), dtype=jnp.float32)

    size = (batch, C, H, W)
    y = jax.block_until_ready(unflatten(x, size))
    ref = x.reshape(size)
    assert y.shape == size
    assert y.dtype == x.dtype
    assert bool(jnp.array_equal(y, ref))

    # -1 inference path (torch.view semantics).
    y2 = jax.block_until_ready(unflatten(x, (batch, -1, H, W)))
    assert y2.shape == size and bool(jnp.array_equal(y2, ref))

    # Awkward (non-multiple-of-128) total -> padded lane-dense path.
    x_odd = jax.random.normal(key, (3, 5, 7), dtype=jnp.float32)
    y3 = jax.block_until_ready(unflatten(x_odd, (105,)))
    assert bool(jnp.array_equal(y3, x_odd.reshape(105)))

    print("KERNEL_OK")
</pallas_src>

<mosaic_0001>
module attributes {stable_mosaic.version = 11 : i64} {
  func.func @_copy_kernel(%arg0: i32, %arg1: memref<8x256xf32, #tpu.memory_space<vmem>>, %arg2: memref<8x256xf32, #tpu.memory_space<vmem>>) attributes {dimension_semantics = [#tpu.dimension_semantics<parallel>], iteration_bounds = array<i64: 1>, scalar_prefetch = 0 : i64, scratch_operands = 0 : i64, tpu.core_type = #tpu.core_type<tc>, window_params = [{transform_indices = @transform_0, window_bounds = array<i64: 8, 256>}, {transform_indices = @transform_1, window_bounds = array<i64: 8, 256>}]} {
    %c0 = arith.constant 0 : index
    %c0_0 = arith.constant 0 : index
    %0 = vector.load %arg1[%c0, %c0_0] : memref<8x256xf32, #tpu.memory_space<vmem>>, vector<8x256xf32>
    %c0_1 = arith.constant 0 : index
    %c0_2 = arith.constant 0 : index
    %1 = vector.load %arg2[%c0_1, %c0_2] : memref<8x256xf32, #tpu.memory_space<vmem>>, vector<8x256xf32>
    tpu.vector_store %arg2[%c0_1, %c0_2], %0 {strides = array<i32>} : memref<8x256xf32, #tpu.memory_space<vmem>>, vector<8x256xf32>,
    return
  }
  func.func @transform_0(%arg0: i32) -> (i32, i32) {
    %c0_i32 = arith.constant 0 : i32
    %c0_i32_0 = arith.constant 0 : i32
    return %arg0, %c0_i32 : i32, i32
  }
  func.func @transform_1(%arg0: i32) -> (i32, i32) {
    %c0_i32 = arith.constant 0 : i32
    %c0_i32_0 = arith.constant 0 : i32
    return %arg0, %c0_i32 : i32, i32
  }
}

</mosaic_0001>

<bundles_post_ra>
// kernel: tpu_custom_call.1
= control target key start
LH: loop header
LB: loop body
LE: loop exit
PB: predicated region body
PF: predicated region fallthrough
CT: control target
= control target key end

     0   :  { %6 = vsyncpa [#allocation3], 0  ;;  %s104_s0 = inlined_call_operand.hbm [shape: f32[8,256], index: 0, kind: input, shape index: {}]   ;;  %s105_s1 = inlined_call_operand.hbm [shape: f32[8,256], index: 1, kind: output, shape index: {}]  }
   0x1   :  { %7 = vsyncpa [#allocation4], 0  ;;  %s86_s6 = smov [#allocation2]  }
   0x2   :  { %s14_s7 = sshll.u32 %s86_s6, 4  ;;  %s15_s7 = int_to_ptr.vmem [resolvable:$true] %s14_s7 }
   0x3   :  { %s50_s8 = scalar_lea.vmem %s15_s7, 256  ;;  %p55_p1 = scmp.lt.s32.totalorder %s15_s7, %s15_s7 }
   0x4   :  { %p51_p0 = scmp.ne.s32.totalorder %s15_s7, %s50_s8  ;;  %p56_p2 = scmp.lt.s32.totalorder %s50_s8, %s50_s8 }
   0x6   :  { %p57_p3 = por %p56_p2, %p55_p1 }
   0x8   :  { %p58_p4 = pnand %p57_p3, %p51_p0 }
   0xa   :  { %61 = shalt.err (!%p58_p4)
}
   0xb   :  { %17 = dma.hbm_to_vmem [thread:$0]  %s104_s0, 256, %s15_s7, [#allocation3]  }
   0xc   :  { %82 = dma.done.wait [#allocation3], 256  }
   0xd   :  { %83 = vsyncadd [#allocation3], 4294967040  ;;  %s87_s11 = smov [#allocation5]   ;;  %v21_v0 = vld [vmem:[#allocation2] sm:$0xff]  ;;  %v22_v1 = vld [vmem:[#allocation2 + $0x8] sm:$0xff] }
   0xe   :  { %s31_s12 = sshll.u32 %s87_s11, 4  ;;  %23 = vst [vmem:[#allocation5] sm:$0xff] %v21_v0  ;;  %24 = vst [vmem:[#allocation5 + $0x8] sm:$0xff] %v22_v1  ;;  %s32_s12 = int_to_ptr.vmem [resolvable:$true] %s31_s12 }
   0xf   :  { %s62_s13 = scalar_lea.vmem %s32_s12, 256  ;;  %p67_p6 = scmp.lt.s32.totalorder %s32_s12, %s32_s12 }
  0x10   :  { %p63_p5 = scmp.ne.s32.totalorder %s32_s12, %s62_s13  ;;  %p68_p7 = scmp.lt.s32.totalorder %s62_s13, %s62_s13 }
  0x12   :  { %p69_p8 = por %p68_p7, %p67_p6 }
  0x14   :  { %p70_p9 = pnand %p69_p8, %p63_p5 }
  0x16   :  { %73 = shalt.err (!%p70_p9)
}
  0x17   :  { %34 = dma.vmem_to_hbm [thread:$0]  %s32_s12, 256, %s105_s1, [#allocation4]  }
  0x18   :  { %84 = dma.done.wait [#allocation4], 256  }
  0x19   :  { %85 = vsyncadd [#allocation4], 4294967040 }
  0x1a   :  { %38 = vsyncpa [#allocation3], 1 }
  0x1b   :  { %39 = vsyncpa [#allocation4], 1 }

</bundles_post_ra>
